<compile_context>
chip_gen: v5e
topology: v5e:2x2
jax: 0.10.0
libtpu: 0.0.40
codegen_flags: <defaults>
</compile_context>

<pallas_src>
import functools

import jax
import jax.numpy as jnp
from jax import lax
from jax.experimental import pallas as pl
from jax.experimental.pallas import tpu as pltpu

_EPS = 1e-8                        # F.cosine_similarity eps
_DEFAULT_VMEM = 32 * 1024 * 1024   # scoped default
_MAX_VMEM = 60 * 1024 * 1024       # stay under v7x's 64 MiB physical VMEM


def _num_blocks(total, want=2):
    """Use a 2-wide parallel grid when possible (dual TensorCores on v7x)."""
    return want if (want > 1 and total % want == 0) else 1


def _vmem_limit(*block_bytes):
    """Double-buffered blocks + headroom, clamped to [32 MiB, 60 MiB]."""
    need = 4 * sum(int(x) for x in block_bytes)
    return int(min(max(need, _DEFAULT_VMEM), _MAX_VMEM))


def _lane_pack(values, n):
    """(n,1,1) per-sub-block scalars -> (1,1,n) lane-dense row.

    Uses a one-hot select + leading-axis sum, which lowers to plain VPU
    selects/adds (no reshape/transpose relayout needed in Mosaic).
    """
    lane = lax.broadcasted_iota(jnp.int32, (n, 1, n), 2)
    grp = lax.broadcasted_iota(jnp.int32, (n, 1, n), 0)
    return jnp.sum(jnp.where(lane == grp, values, 0.0), axis=0, keepdims=True)


# ---------------------------------------------------------------------------
# Kernel 1: per-batch mean cosine similarity between two (N, C) feature sets,
# vectorized over `bt` batches per grid step.
# ---------------------------------------------------------------------------
def _global_cos_kernel(x_ref, y_ref, o_ref, *, bt):
    x = x_ref[...].astype(jnp.float32)                                # (bt, N, C)
    y = y_ref[...].astype(jnp.float32)
    dots = jnp.sum(x * y, axis=2, keepdims=True)                      # (bt, N, 1)
    nx = jnp.sqrt(jnp.sum(x * x, axis=2, keepdims=True))
    ny = jnp.sqrt(jnp.sum(y * y, axis=2, keepdims=True))
    cos = dots / (jnp.maximum(nx, _EPS) * jnp.maximum(ny, _EPS))
    mean_cos = jnp.mean(cos, axis=1, keepdims=True)                   # (bt, 1, 1)
    o_ref[...] = _lane_pack(mean_cos, bt)                             # (1, 1, bt)


def global_cosine_mean(logits, logits1):
    b, n, c = logits.shape
    nb = _num_blocks(b)
    bt = b // nb
    blk_bytes = bt * n * c * logits.dtype.itemsize
    out = pl.pallas_call(
        functools.partial(_global_cos_kernel, bt=bt),
        out_shape=jax.ShapeDtypeStruct((nb, 1, bt), jnp.float32),
        grid_spec=pltpu.PrefetchScalarGridSpec(
            num_scalar_prefetch=0,
            grid=(nb,),
            in_specs=[pl.BlockSpec((bt, n, c), lambda i: (i, 0, 0)),
                      pl.BlockSpec((bt, n, c), lambda i: (i, 0, 0))],
            out_specs=pl.BlockSpec((1, 1, bt), lambda i: (i, 0, 0))),
        compiler_params=pltpu.CompilerParams(
            dimension_semantics=("parallel",),
            vmem_limit_bytes=_vmem_limit(blk_bytes, blk_bytes)),
    )(logits, logits1)
    return out.reshape(b)                                             # (b,)


# ---------------------------------------------------------------------------
# Kernel 2: per-group loss (200 * Similarity_Loss + cal_TCR), vectorized over
# `gt` groups of shape (P, C) per grid step.
# ---------------------------------------------------------------------------
def _group_loss_kernel(g_ref, o_ref, *, tcr_scale, gt):
    x = g_ref[...].astype(jnp.float32)                                # (Gt, P, C)
    mu = jnp.mean(x, axis=1, keepdims=True)                           # (Gt, 1, C)
    mu_norm = jnp.sqrt(jnp.sum(mu * mu, axis=2, keepdims=True))       # (Gt, 1, 1)
    vnorm2 = jnp.sum(x * x, axis=2, keepdims=True)                    # (Gt, P, 1)
    vnorm = jnp.sqrt(vnorm2)
    dots = jnp.sum(x * mu, axis=2, keepdims=True)                     # (Gt, P, 1)
    cos = dots / (jnp.maximum(vnorm, _EPS) * jnp.maximum(mu_norm, _EPS))
    # 200*Similarity_Loss + cal_TCR; both are means over the same P patches:
    #   Similarity_Loss = -mean_p(cos) ;  TCR row term = -0.5*log(1 + s*||v||^2)
    per_point = -200.0 * cos - 0.5 * jnp.log(1.0 + tcr_scale * vnorm2)
    total = jnp.mean(per_point, axis=1, keepdims=True)                # (Gt, 1, 1)
    o_ref[...] = _lane_pack(total, gt)                                # (1, 1, Gt)


def group_losses(groups, tcr_scale):
    g, p, c = groups.shape
    nb = _num_blocks(g)            # g = 2*b*downsample is always even -> nb = 2
    gt = g // nb
    blk_bytes = gt * p * c * groups.dtype.itemsize
    out = pl.pallas_call(
        functools.partial(_group_loss_kernel, tcr_scale=tcr_scale, gt=gt),
        out_shape=jax.ShapeDtypeStruct((nb, 1, gt), jnp.float32),
        grid_spec=pltpu.PrefetchScalarGridSpec(
            num_scalar_prefetch=0,
            grid=(nb,),
            in_specs=[pl.BlockSpec((gt, p, c), lambda i: (i, 0, 0))],
            out_specs=pl.BlockSpec((1, 1, gt), lambda i: (i, 0, 0))),
        compiler_params=pltpu.CompilerParams(
            dimension_semantics=("parallel",),
            vmem_limit_bytes=_vmem_limit(blk_bytes)),
    )(groups)
    return out.reshape(g)                                             # (g,)


# ---------------------------------------------------------------------------
# Plain-JAX glue: FPS, KNN grouping (sequential / gather heavy).
# ---------------------------------------------------------------------------
def furthest_point_sample(xyz, npoint):
    # xyz: (B, N, 3) -> (B, npoint) int32; starts at index 0 like pointnet2 FPS.
    # TODO(synk): at realistic N a VMEM-resident Pallas FPS (points + running
    # min-distance kept on-chip across the serial loop) would dominate less.
    n = xyz.shape[1]

    def per_batch(pts):
        def body(i, state):
            idxs, dists, last = state
            d = jnp.sum((pts - pts[last]) ** 2, axis=-1)
            dists = jnp.minimum(dists, d)
            nxt = jnp.argmax(dists).astype(jnp.int32)
            idxs = idxs.at[i].set(nxt)
            return idxs, dists, nxt

        idxs = jnp.zeros((npoint,), jnp.int32)
        dists = jnp.full((n,), 1e10, jnp.float32)
        idxs, _, _ = lax.fori_loop(1, npoint, body, (idxs, dists, jnp.int32(0)))
        return idxs

    return jax.vmap(per_batch)(xyz)


def knn_group_features(query_xyz, support_xyz, features, nsample):
    # query (B, S, 3), support (B, N, 3), features (B, N, C) -> (B, S, nsample, C)
    # Squared distances via the MXU-friendly expansion ||q||^2 + ||s||^2 - 2 q.s
    q2 = jnp.sum(query_xyz * query_xyz, axis=-1)[:, :, None]          # (B, S, 1)
    s2 = jnp.sum(support_xyz * support_xyz, axis=-1)[:, None, :]      # (B, 1, N)
    qs = jnp.einsum('bsd,bnd->bsn', query_xyz, support_xyz,
                    preferred_element_type=jnp.float32)               # (B, S, N)
    d2 = q2 + s2 - 2.0 * qs
    _, idx = lax.top_k(-d2, nsample)                                  # (B, S, ns)
    fj = jax.vmap(lambda f, i: f[i])(features, idx)                   # (B, S, ns, C)
    return fj


# ---------------------------------------------------------------------------
# My_super_loss_kmeans2 equivalent (globalpointloss + groupinnerloss terms).
# ---------------------------------------------------------------------------
class MySuperLossKMeans2:
    def __init__(self, bs):
        self.nsample = 32
        self.b = bs
        self.eps = 0.2
        self.K = 5
        # parameter `w` (shape (1,), filled with 0.75) is created for parity
        # with the module; it is not used in forward.
        self.w = jnp.full((1,), 0.75, jnp.float32)

    def __call__(self, logits, logits1, p0first, p0sec, orixyz):
        del orixyz  # unused by the loss terms ported here
        b, n, c = logits.shape
        downsample = n // 16

        # --- global cosine-similarity term (Pallas kernel, no wrapper cast) ---
        per_batch_cos = global_cosine_mean(logits, logits1)
        globalpointloss = -jnp.sum(per_batch_cos) / self.b

        # --- FPS + gathers + KNN grouping (glue) ---
        idx = furthest_point_sample(p0first, downsample)
        idx1 = furthest_point_sample(p0sec, downsample)
        new_p = jnp.take_along_axis(p0first, idx[..., None], axis=1)
        new_p1 = jnp.take_along_axis(p0sec, idx1[..., None], axis=1)
        fi = jnp.take_along_axis(logits, idx[..., None], axis=1)       # (b, ds, c)
        fi1 = jnp.take_along_axis(logits1, idx1[..., None], axis=1)
        fj = knn_group_features(new_p, p0first, logits, self.nsample)  # (b,ds,ns,c)
        fj1 = knn_group_features(new_p1, p0sec, logits1, self.nsample)

        # datatemp = cat(fjj[point], center) -> (nsample+1, c) per group
        groups0 = jnp.concatenate([fj, fi[:, :, None, :]], axis=2)
        groups1 = jnp.concatenate([fj1, fi1[:, :, None, :]], axis=2)
        groups = jnp.stack([groups0, groups1], axis=0)                 # (2,b,ds,P,c)
        gflat = groups.reshape(2 * b * downsample, self.nsample + 1, c)

        tcr_scale = float(c) / (self.b * self.eps)  # p / (m * eps) in TotalCodingRate
        contrib = group_losses(gflat, tcr_scale).reshape(2, b, downsample)

        # reproduce the reference's (quirky) accumulation order exactly:
        # the running sum is divided by `downsample` at the end of each batch step.
        g = jnp.float32(0.0)
        for index in range(self.b):
            g = g + jnp.sum(contrib[0, index]) + jnp.sum(contrib[1, index])
            g = g / downsample
        g = g / self.b

        # TODO(synk): the detached kmeans/Calinski-Harabasz `groupouterloss` term (unseeded np.random centroid init, data-dependent while-loop convergence, NaN-repair, host prints, all under torch.no_grad) is host-side stochastic glue and is not ported.
        return globalpointloss + g


if __name__ == "__main__":
    key = jax.random.PRNGKey(0)
    b, n, c = 2, 64, 16        # downsample = n // 16 = 4, nsample = 32 neighbors
    k1, k2, k3, k4, k5 = jax.random.split(key, 5)
    logits = jax.random.normal(k1, (b, n, c), jnp.float32)
    logits1 = jax.random.normal(k2, (b, n, c), jnp.float32)
    p0first = jax.random.uniform(k3, (b, n, 3), jnp.float32)
    p0sec = jax.random.uniform(k4, (b, n, 3), jnp.float32)
    orixyz = jax.random.uniform(k5, (b, n, 3), jnp.float32)

    loss_fn = MySuperLossKMeans2(bs=b)
    loss = loss_fn(logits, logits1, p0first, p0sec, orixyz)
    jax.block_until_ready(loss)
    print("KERNEL_OK")
</pallas_src>

<mosaic_0001>
module attributes {stable_mosaic.version = 11 : i64} {
  func.func @_global_cos_kernel(%arg0: i32, %arg1: memref<1x64x16xf32, #tpu.memory_space<vmem>>, %arg2: memref<1x64x16xf32, #tpu.memory_space<vmem>>, %arg3: memref<1x1x1xf32, #tpu.memory_space<vmem>>) attributes {dimension_semantics = [#tpu.dimension_semantics<parallel>], iteration_bounds = array<i64: 2>, scalar_prefetch = 0 : i64, scratch_operands = 0 : i64, tpu.core_type = #tpu.core_type<tc>, window_params = [{transform_indices = @transform_0, window_bounds = array<i64: 1, 64, 16>}, {transform_indices = @transform_1, window_bounds = array<i64: 1, 64, 16>}, {transform_indices = @transform_2, window_bounds = array<i64: 1, 1, 1>}]} {
    %c0 = arith.constant 0 : index
    %c0_0 = arith.constant 0 : index
    %c0_1 = arith.constant 0 : index
    %0 = vector.load %arg1[%c0, %c0_0, %c0_1] : memref<1x64x16xf32, #tpu.memory_space<vmem>>, vector<1x64x16xf32>
    %c0_2 = arith.constant 0 : index
    %c0_3 = arith.constant 0 : index
    %c0_4 = arith.constant 0 : index
    %1 = vector.load %arg2[%c0_2, %c0_3, %c0_4] : memref<1x64x16xf32, #tpu.memory_space<vmem>>, vector<1x64x16xf32>
    %2 = arith.mulf %0, %1 : vector<1x64x16xf32>
    %cst = arith.constant dense<0.000000e+00> : vector<1x64xf32>
    %3 = vector.multi_reduction <add>, %2, %cst [2] : vector<1x64x16xf32> to vector<1x64xf32>
    %4 = vector.shape_cast %3 : vector<1x64xf32> to vector<1x64x1xf32>
    %5 = arith.mulf %0, %0 : vector<1x64x16xf32>
    %cst_5 = arith.constant dense<0.000000e+00> : vector<1x64xf32>
    %6 = vector.multi_reduction <add>, %5, %cst_5 [2] : vector<1x64x16xf32> to vector<1x64xf32>
    %7 = vector.shape_cast %6 : vector<1x64xf32> to vector<1x64x1xf32>
    %8 = math.sqrt %7 : vector<1x64x1xf32>
    %9 = arith.mulf %1, %1 : vector<1x64x16xf32>
    %cst_6 = arith.constant dense<0.000000e+00> : vector<1x64xf32>
    %10 = vector.multi_reduction <add>, %9, %cst_6 [2] : vector<1x64x16xf32> to vector<1x64xf32>
    %11 = vector.shape_cast %10 : vector<1x64xf32> to vector<1x64x1xf32>
    %12 = math.sqrt %11 : vector<1x64x1xf32>
    %cst_7 = arith.constant 9.99999993E-9 : f32
    %13 = vector.broadcast %cst_7 : f32 to vector<1x64x1xf32>
    %14 = arith.maximumf %8, %13 : vector<1x64x1xf32>
    %cst_8 = arith.constant 9.99999993E-9 : f32
    %15 = vector.broadcast %cst_8 : f32 to vector<1x64x1xf32>
    %16 = arith.maximumf %12, %15 : vector<1x64x1xf32>
    %17 = arith.mulf %14, %16 : vector<1x64x1xf32>
    %18 = arith.divf %4, %17 : vector<1x64x1xf32>
    %cst_9 = arith.constant dense<0.000000e+00> : vector<1x1xf32>
    %19 = vector.multi_reduction <add>, %18, %cst_9 [1] : vector<1x64x1xf32> to vector<1x1xf32>
    %20 = vector.shape_cast %19 : vector<1x1xf32> to vector<1x1x1xf32>
    %cst_10 = arith.constant 6.400000e+01 : f32
    %21 = vector.broadcast %cst_10 : f32 to vector<1x1x1xf32>
    %22 = arith.divf %20, %21 : vector<1x1x1xf32>
    %23 = tpu.iota {dimensions = array<i32: 2>} : vector<1x1x1xi32>
    %24 = tpu.iota {dimensions = array<i32: 0>} : vector<1x1x1xi32>
    %25 = arith.cmpi eq, %23, %24 : vector<1x1x1xi32>
    %cst_11 = arith.constant 0.000000e+00 : f32
    %26 = vector.broadcast %cst_11 : f32 to vector<1x1x1xf32>
    %27 = arith.select %25, %22, %26 : vector<1x1x1xi1>, vector<1x1x1xf32>
    %cst_12 = arith.constant dense<0.000000e+00> : vector<1x1xf32>
    %28 = vector.multi_reduction <add>, %27, %cst_12 [0] : vector<1x1x1xf32> to vector<1x1xf32>
    %29 = vector.shape_cast %28 : vector<1x1xf32> to vector<1x1x1xf32>
    %c0_13 = arith.constant 0 : index
    %c0_14 = arith.constant 0 : index
    %c0_15 = arith.constant 0 : index
    %30 = vector.load %arg3[%c0_13, %c0_14, %c0_15] : memref<1x1x1xf32, #tpu.memory_space<vmem>>, vector<1x1x1xf32>
    tpu.vector_store %arg3[%c0_13, %c0_14, %c0_15], %29 {strides = array<i32>} : memref<1x1x1xf32, #tpu.memory_space<vmem>>, vector<1x1x1xf32>,
    return
  }
  func.func @transform_0(%arg0: i32) -> (i32, i32, i32) {
    %c0_i32 = arith.constant 0 : i32
    %c0_i32_0 = arith.constant 0 : i32
    %c0_i32_1 = arith.constant 0 : i32
    return %arg0, %c0_i32, %c0_i32_0 : i32, i32, i32
  }
  func.func @transform_1(%arg0: i32) -> (i32, i32, i32) {
    %c0_i32 = arith.constant 0 : i32
    %c0_i32_0 = arith.constant 0 : i32
    %c0_i32_1 = arith.constant 0 : i32
    return %arg0, %c0_i32, %c0_i32_0 : i32, i32, i32
  }
  func.func @transform_2(%arg0: i32) -> (i32, i32, i32) {
    %c0_i32 = arith.constant 0 : i32
    %c0_i32_0 = arith.constant 0 : i32
    %c0_i32_1 = arith.constant 0 : i32
    return %arg0, %c0_i32, %c0_i32_0 : i32, i32, i32
  }
}

</mosaic_0001>

<bundles_post_ra>
// kernel: tpu_custom_call.1
= control target key start
LH: loop header
LB: loop body
LE: loop exit
PB: predicated region body
PF: predicated region fallthrough
CT: control target
= control target key end

     0   :  { %s792_s9 = smov 0   ;;  %s1314_s0 = inlined_call_operand.vmem [shape: f32[2,64,16], index: 0, kind: input, shape index: {}]   ;;  %s1315_s1 = inlined_call_operand.vmem [shape: f32[2,64,16], index: 1, kind: input, shape index: {}]   ;;  %s1316_s2 = inlined_call_operand.vmem [shape: f32[2,1,1], index: 2, kind: output, shape index: {}]  }
   0x1 LB: > { %s696_s10 = sadd.s32 4294967295, %s774_s9   ;;  %p700_p0 = scmp.ge.s32.totalorder %s774_s9, 1  ;;  %s774_s9 = sphi %s792_s9, %s12_s9  }
   0x2   : > { %p122_p1 = scmp.lt.s32.totalorder %s774_s9, 3 }
   0x4   : > { %p123_p2 = pnand %p700_p0, %p122_p1 }
   0x5   : > { %p147_p3 = scmp.lt.s32.totalorder (!%p123_p2), %s696_s10, 1 }
   0x6   : > { %126 = sbr.rel (%p123_p2) target bundleno = 249 (0xf9), region = 28 }
   0xb   : > { %s1340_s10 = smov (!%p147_p3, %s696_s10), 1  ;;  %vm184_vm0 = vcmask 130048  }
   0xc   : > { %s707_s11 = sshll.u32 %s1340_s10, 6  ;;  %s159_s20 = scalar_lea.vmem %s1316_s2, %s1340_s10 }
   0xd   : > { %s806_s14 = scalar_lea.vmem %s1315_s1, %s707_s11  ;;  %s811_s17 = scalar_lea.vmem %s1314_s0, %s707_s11 }
   0xe   : > { %v168_v0 = vld [vmem:[%s806_s14] sm:$0xff]  ;;  %v815_v1 = vld [vmem:[%s811_s17 + $0x10] sm:$0xff]  ;;  %v169_v6 = vld [vmem:[%s806_s14 + $0x8] sm:$0xff] }
   0xf   : > { %v160_v2 = vld [vmem:[%s811_s17] sm:$0xff]  ;;  %v337_v3 = vmul.f32 %v168_v0, %v168_v0  ;;  %v211_v4 = vmul.f32 %v815_v1, %v815_v1  ;;  %v822_v7 = vld [vmem:[%s806_s14 + $0x10] sm:$0xff]  ;;  %v161_v11 = vld [vmem:[%s811_s17 + $0x8] sm:$0xff]  ;;  %v338_v12 = vmul.f32 %v169_v6, %v169_v6 }
  0x10   : > { %v209_v5 = vmul.f32 %v160_v2, %v160_v2  ;;  %v339_v13 = vmul.f32 %v822_v7, %v822_v7  ;;  %v210_v14 = vmul.f32 %v161_v11, %v161_v11  ;;  %v171_v18 = vld [vmem:[%s806_s14 + $0x18] sm:$0xff]  ;;  %v164_v19 = vld [vmem:[%s811_s17 + $0x20] sm:$0xff]  ;;  %v165_v27 = vld [vmem:[%s811_s17 + $0x28] sm:$0xff]  ;;  %v176_v46 = vmul.f32 %v168_v0, %v160_v2 }
  0x11   : > { %v345_v8 = vsel %vm184_vm0, %v337_v3, 0.0  ;;  %v223_v9 = vsel %vm184_vm0, %v211_v4, 0.0  ;;  %v348_v15 = vsel %vm184_vm0, %v338_v12, 0.0  ;;  %v163_v20 = vld [vmem:[%s811_s17 + $0x18] sm:$0xff]  ;;  %v340_v21 = vmul.f32 %v171_v18, %v171_v18  ;;  %v173_v28 = vld [vmem:[%s806_s14 + $0x28] sm:$0xff]  ;;  %v172_v29 = vld [vmem:[%s806_s14 + $0x20] sm:$0xff] }
  0x12   : > { %v217_v10 = vsel %vm184_vm0, %v209_v5, 0.0  ;;  %346 = vadd.xlane.f32.xlu1 %v345_v8  ;;  %224 = vadd.xlane.f32.xlu2 %v223_v9  ;;  %v351_v16 = vsel %vm184_vm0, %v339_v13, 0.0  ;;  %v220_v17 = vsel %vm184_vm0, %v210_v14, 0.0  ;;  %v213_v22 = vmul.f32 %v164_v19, %v164_v19  ;;  %v174_v36 = vld [vmem:[%s806_s14 + $0x30] sm:$0xff]  ;;  %v167_v37 = vld [vmem:[%s811_s17 + $0x38] sm:$0xff] }
  0x13   : > { %218 = vadd.xlane.f32.xlu0 %v217_v10  ;;  %v212_v23 = vmul.f32 %v163_v20, %v163_v20  ;;  %v354_v24 = vsel %vm184_vm0, %v340_v21, 0.0  ;;  %v214_v30 = vmul.f32 %v165_v27, %v165_v27  ;;  %v342_v31 = vmul.f32 %v173_v28, %v173_v28  ;;  %v166_v38 = vld [vmem:[%s811_s17 + $0x30] sm:$0xff]  ;;  %v175_v45 = vld [vmem:[%s806_s14 + $0x38] sm:$0xff] }
  0x14   : > { %v229_v25 = vsel %vm184_vm0, %v213_v22, 0.0  ;;  %v341_v32 = vmul.f32 %v172_v29, %v172_v29  ;;  %v343_v39 = vmul.f32 %v174_v36, %v174_v36  ;;  %v216_v40 = vmul.f32 %v167_v37, %v167_v37 }
  0x15   : > { %v226_v26 = vsel %vm184_vm0, %v212_v23, 0.0  ;;  %v232_v33 = vsel %vm184_vm0, %v214_v30, 0.0  ;;  %v360_v34 = vsel %vm184_vm0, %v342_v31, 0.0  ;;  %v215_v41 = vmul.f32 %v166_v38, %v166_v38 }
  0x16   : > { %v357_v35 = vsel %vm184_vm0, %v341_v32, 0.0  ;;  %v363_v42 = vsel %vm184_vm0, %v343_v39, 0.0  ;;  %v238_v43 = vsel %vm184_vm0, %v216_v40, 0.0  ;;  %v177_v47 = vmul.f32 %v169_v6, %v161_v11 }
  0x17   : > { %v235_v44 = vsel %vm184_vm0, %v215_v41, 0.0  ;;  %v344_v48 = vmul.f32 %v175_v45, %v175_v45  ;;  %v185_v49 = vsel %vm184_vm0, %v176_v46, 0.0  ;;  %v179_v52 = vmul.f32 %v171_v18, %v163_v20 }
  0x18   : > { %v188_v50 = vsel %vm184_vm0, %v177_v47, 0.0  ;;  %v180_v53 = vmul.f32 %v172_v29, %v164_v19  ;;  %v178_v54 = vmul.f32 %v822_v7, %v815_v1  ;;  %v182_v58 = vmul.f32 %v174_v36, %v166_v38 }
  0x19   : > { %v366_v51 = vsel %vm184_vm0, %v344_v48, 0.0  ;;  %v194_v55 = vsel %vm184_vm0, %v179_v52, 0.0  ;;  %v183_v59 = vmul.f32 %v175_v45, %v167_v37  ;;  %v181_v60 = vmul.f32 %v173_v28, %v165_v27 }
  0x1a   : > { %349 = vadd.xlane.f32.xlu1 %v348_v15  ;;  %352 = vadd.xlane.f32.xlu2 %v351_v16  ;;  %v197_v56 = vsel %vm184_vm0, %v180_v53, 0.0  ;;  %v191_v57 = vsel %vm184_vm0, %v178_v54, 0.0  ;;  %v203_v61 = vsel %vm184_vm0, %v182_v58, 0.0 }
  0x1b   : > { %221 = vadd.xlane.f32.xlu0 %v220_v17  ;;  %v206_v62 = vsel %vm184_vm0, %v183_v59, 0.0  ;;  %v200_v63 = vsel %vm184_vm0, %v181_v60, 0.0 }
  0x22   : > { %355 = vadd.xlane.f32.xlu1 %v354_v24  ;;  %230 = vadd.xlane.f32.xlu2 %v229_v25 }
  0x23   : > { %227 = vadd.xlane.f32.xlu0 %v226_v26 }
  0x2a   : > { %233 = vadd.xlane.f32.xlu1 %v232_v33  ;;  %361 = vadd.xlane.f32.xlu2 %v360_v34 }
  0x2b   : > { %358 = vadd.xlane.f32.xlu0 %v357_v35 }
  0x32   : > { %364 = vadd.xlane.f32.xlu1 %v363_v42  ;;  %239 = vadd.xlane.f32.xlu2 %v238_v43 }
  0x33   : > { %236 = vadd.xlane.f32.xlu0 %v235_v44 }
  0x3a   : > { %186 = vadd.xlane.f32.xlu1 %v185_v49  ;;  %189 = vadd.xlane.f32.xlu2 %v188_v50 }
  0x3b   : > { %367 = vadd.xlane.f32.xlu0 %v366_v51 }
  0x42   : > { %195 = vadd.xlane.f32.xlu1 %v194_v55  ;;  %198 = vadd.xlane.f32.xlu2 %v197_v56 }
  0x43   : > { %192 = vadd.xlane.f32.xlu0 %v191_v57 }
  0x4a   : > { %204 = vadd.xlane.f32.xlu1 %v203_v61  ;;  %207 = vadd.xlane.f32.xlu2 %v206_v62 }
  0x4b   : > { %201 = vadd.xlane.f32.xlu0 %v200_v63 }
  0x85   : > { %v863_v0 = vpop.xlane.xlu1 %346  ;;  %v865_v1 = vpop.xlane.xlu2 %224 }
  0x86   : > { %718 = vrsqrt.f32 %v863_v0  ;;  %v868_v2 = vpop.xlane.xlu0 %218  ;;  %vm376_vm1 = vcmp.eq.f32.partialorder %v863_v0, inf  ;;  %vm378_vm2 = vcmp.eq.f32.partialorder %v863_v0, 0.0  ;;  %v379_v44 = vand.u32 2147483648, %v863_v0 }
  0x87   : > { %720 = vrsqrt.f32 %v865_v1  ;;  %vm272_vm3 = vcmp.eq.f32.partialorder %v865_v1, inf  ;;  %vm274_vm4 = vcmp.eq.f32.partialorder %v865_v1, 0.0  ;;  %v275_v50 = vand.u32 2147483648, %v865_v1 }
  0x88   : > { %722 = vrsqrt.f32 %v868_v2  ;;  %vm248_vm5 = vcmp.eq.f32.partialorder %v868_v2, inf  ;;  %vm250_vm6 = vcmp.eq.f32.partialorder %v868_v2, 0.0  ;;  %v251_v54 = vand.u32 2147483648, %v868_v2 }
  0x8c   : > { %v719_v3 = vpop.eup %718 }
  0x8d   : > { %v721_v4 = vpop.eup %720  ;;  %v370_v5 = vmul.f32 %v719_v3, %v863_v0  ;;  %v873_v6 = vpop.xlane.xlu1 %349 }
  0x8e   : > { %v875_v7 = vpop.xlane.xlu2 %352  ;;  %v723_v8 = vpop.eup %722  ;;  %v266_v9 = vmul.f32 %v721_v4, %v865_v1  ;;  %724 = vrsqrt.f32 %v873_v6  ;;  %vm388_vm7 = vcmp.eq.f32.partialorder %v873_v6, inf  ;;  %v391_v57 = vand.u32 2147483648, %v873_v6 }
  0x8f   : > { %v879_v10 = vpop.xlane.xlu0 %221  ;;  %v242_v11 = vmul.f32 %v723_v8, %v868_v2  ;;  %726 = vrsqrt.f32 %v875_v7  ;;  %v371_v12 = vmul.f32 %v719_v3, %v370_v5  ;;  %vm400_vm8 = vcmp.eq.f32.partialorder %v875_v7, inf }
  0x90   : > { %v267_v13 = vmul.f32 %v721_v4, %v266_v9  ;;  %728 = vrsqrt.f32 %v879_v10  ;;  %vm390_vm9 = vcmp.eq.f32.partialorder %v873_v6, 0.0  ;;  %vm402_vm10 = vcmp.eq.f32.partialorder %v875_v7, 0.0 }
  0x91   : > { %v243_v14 = vmul.f32 %v723_v8, %v242_v11  ;;  %v372_v16 = vmul.f32 0.5, %v371_v12  ;;  %v403_v12 = vand.u32 2147483648, %v875_v7  ;;  %vm260_vm11 = vcmp.eq.f32.partialorder %v879_v10, inf }
  0x92   : > { %v268_v18 = vmul.f32 0.5, %v267_v13  ;;  %vm262_vm12 = vcmp.eq.f32.partialorder %v879_v10, 0.0 }
  0x93   : > { %v244_v21 = vmul.f32 0.5, %v243_v14  ;;  %v373_v26 = vsub.f32 1.5, %v372_v16 }
  0x94   : > { %v725_v15 = vpop.eup %724  ;;  %v269_v29 = vsub.f32 1.5, %v268_v18 }
  0x95   : > { %v727_v17 = vpop.eup %726  ;;  %v382_v19 = vmul.f32 %v725_v15, %v873_v6  ;;  %v885_v20 = vpop.xlane.xlu1 %355  ;;  %v245_v31 = vsub.f32 1.5, %v244_v21  ;;  %v374_v34 = vmul.f32 %v719_v3, %v373_v26 }
  0x96   : > { %v394_v22 = vmul.f32 %v727_v17, %v875_v7  ;;  %730 = vrsqrt.f32 %v885_v20  ;;  %v889_v23 = vpop.xlane.xlu2 %230  ;;  %v729_v25 = vpop.eup %728  ;;  %v270_v36 = vmul.f32 %v721_v4, %v269_v29  ;;  %vm412_vm13 = vcmp.eq.f32.partialorder %v885_v20, inf }
  0x97   : > { %v891_v24 = vpop.xlane.xlu0 %227  ;;  %v383_v27 = vmul.f32 %v725_v15, %v382_v19  ;;  %v254_v28 = vmul.f32 %v729_v25, %v879_v10  ;;  %732 = vrsqrt.f32 %v889_v23  ;;  %v246_v39 = vmul.f32 %v723_v8, %v245_v31 }
  0x98   : > { %v395_v30 = vmul.f32 %v727_v17, %v394_v22  ;;  %734 = vrsqrt.f32 %v891_v24  ;;  %v375_v43 = vmul.f32 %v374_v34, %v863_v0  ;;  %v271_v48 = vmul.f32 %v270_v36, %v865_v1 }
  0x99   : > { %v255_v32 = vmul.f32 %v729_v25, %v254_v28  ;;  %v384_v35 = vmul.f32 0.5, %v383_v27  ;;  %v247_v51 = vmul.f32 %v246_v39, %v868_v2  ;;  %v415_v28 = vand.u32 2147483648, %v885_v20 }
  0x9a   : > { %v396_v37 = vmul.f32 0.5, %v395_v30  ;;  %v377_v55 = vsel %vm376_vm1, %v863_v0, %v375_v43  ;;  %v273_v60 = vsel %vm272_vm3, %v865_v1, %v271_v48  ;;  %vm414_vm14 = vcmp.eq.f32.partialorder %v885_v20, 0.0 }
  0x9b   : > { %v256_v40 = vmul.f32 0.5, %v255_v32  ;;  %v385_v45 = vsub.f32 1.5, %v384_v35  ;;  %v249_v62 = vsel %vm248_vm5, %v868_v2, %v247_v51  ;;  %v948_v11 = vsel %vm378_vm2, %v379_v44, %v377_v55 }
  0x9c   : > { %v895_v33 = vpop.eup %730  ;;  %v397_v49 = vsub.f32 1.5, %v396_v37  ;;  %v961_v0 = vsel %vm274_vm4, %v275_v50, %v273_v60  ;;  %v473_v1 = vmax.f32 %v948_v11, 1e-08  ;;  %v263_v2 = vand.u32 2147483648, %v879_v10 }
  0x9d   : > { %v897_v38 = vpop.xlane.xlu1 %233  ;;  %v406_v41 = vmul.f32 %v895_v33, %v885_v20  ;;  %v911_v47 = vpop.eup %732  ;;  %v257_v52 = vsub.f32 1.5, %v256_v40  ;;  %v386_v56 = vmul.f32 %v725_v15, %v385_v45  ;;  %v467_v29 = vmax.f32 %v961_v0, 1e-08 }
  0x9e   : > { %v909_v46 = vpop.xlane.xlu2 %361  ;;  %736 = vrsqrt.f32 %v897_v38  ;;  %v290_v58 = vmul.f32 %v911_v47, %v889_v23  ;;  %v929_v59 = vpop.eup %734  ;;  %v398_v61 = vmul.f32 %v727_v17, %v397_v49  ;;  %v965_v17 = vsel %vm250_vm6, %v251_v54, %v249_v62 }
  0x9f   : > { %v901_v42 = vpop.xlane.xlu0 %358  ;;  %v407_v53 = vmul.f32 %v895_v33, %v406_v41  ;;  %738 = vrsqrt.f32 %v909_v46  ;;  %v258_v63 = vmul.f32 %v729_v25, %v257_v52  ;;  %v278_v4 = vmul.f32 %v929_v59, %v891_v24 }
  0xa0   : > { %740 = vrsqrt.f32 %v901_v42  ;;  %v387_v13 = vmul.f32 %v386_v56, %v873_v6  ;;  %v291_v14 = vmul.f32 %v911_v47, %v290_v58  ;;  %v399_v18 = vmul.f32 %v398_v61, %v875_v7 }
  0xa1   : > { %v408_v3 = vmul.f32 0.5, %v407_v53  ;;  %v279_v15 = vmul.f32 %v929_v59, %v278_v4  ;;  %v259_v19 = vmul.f32 %v258_v63, %v879_v10  ;;  %v465_v35 = vmax.f32 %v965_v17, 1e-08 }
  0xa2   : > { %v389_v30 = vsel %vm388_vm7, %v873_v6, %v387_v13  ;;  %v292_v31 = vmul.f32 0.5, %v291_v14  ;;  %v401_v36 = vsel %vm400_vm8, %v875_v7, %v399_v18  ;;  %v299_v49 = vand.u32 2147483648, %v889_v23 }
  0xa3   : > { %v409_v21 = vsub.f32 1.5, %v408_v3  ;;  %v280_v22 = vmul.f32 0.5, %v279_v15  ;;  %v261_v39 = vsel %vm260_vm11, %v879_v10, %v259_v19  ;;  %v392_v48 = vsel %vm390_vm9, %v391_v57, %v389_v30 }
  0xa4   : > { %v944_v9 = vpop.eup %736  ;;  %v1003_v51 = vsel %vm402_vm10, %v403_v12, %v401_v36  ;;  %v264_v6 = vsel %vm262_vm12, %v263_v2, %v261_v39  ;;  %v474_v61 = vmax.f32 %v392_v48, 1e-08  ;;  %vm296_vm15 = vcmp.eq.f32.partialorder %v889_v23, inf }
  0xa5   : > { %v940_v5 = vpop.xlane.xlu1 %364  ;;  %v302_v16 = vmul.f32 %v944_v9, %v897_v38  ;;  %v739_v27 = vpop.eup %738  ;;  %v281_v37 = vsub.f32 1.5, %v280_v22  ;;  %v410_v40 = vmul.f32 %v895_v33, %v409_v21  ;;  %v293_v33 = vsub.f32 1.5, %v292_v31 }
  0xa6   : > { %742 = vrsqrt.f32 %v940_v5  ;;  %v971_v26 = vpop.xlane.xlu2 %239  ;;  %v430_v32 = vmul.f32 %v739_v27, %v909_v46  ;;  %v741_v34 = vpop.eup %740  ;;  %vm284_vm0 = vcmp.eq.f32.partialorder %v891_v24, inf  ;;  %v287_v10 = vand.u32 2147483648, %v891_v24 }
  0xa7   : > { %v942_v8 = vpop.xlane.xlu0 %236  ;;  %v303_v25 = vmul.f32 %v944_v9, %v302_v16  ;;  %744 = vrsqrt.f32 %v971_v26  ;;  %v418_v50 = vmul.f32 %v741_v34, %v901_v42  ;;  %v282_v54 = vmul.f32 %v929_v59, %v281_v37 }
  0xa8   : > { %v431_v43 = vmul.f32 %v739_v27, %v430_v32  ;;  %746 = vrsqrt.f32 %v942_v8  ;;  %v411_v56 = vmul.f32 %v410_v40, %v885_v20  ;;  %v475_v59 = vmax.f32 %v1003_v51, 1e-08 }
  0xa9   : > { %v304_v41 = vmul.f32 0.5, %v303_v25  ;;  %v419_v55 = vmul.f32 %v741_v34, %v418_v50  ;;  %v294_v63 = vmul.f32 %v911_v47, %v293_v33  ;;  %vm286_vm1 = vcmp.eq.f32.partialorder %v891_v24, 0.0 }
  0xaa   : > { %v432_v52 = vmul.f32 0.5, %v431_v43  ;;  %v311_v3 = vand.u32 2147483648, %v897_v38  ;;  %v466_v13 = vmax.f32 %v264_v6, 1e-08  ;;  %v283_v14 = vmul.f32 %v282_v54, %v891_v24 }
  0xab   : > { %v305_v7 = vsub.f32 1.5, %v304_v41  ;;  %v420_v62 = vmul.f32 0.5, %v419_v55  ;;  %vm308_vm2 = vcmp.eq.f32.partialorder %v897_v38, inf  ;;  %v413_v17 = vsel %vm412_vm13, %v885_v20, %v411_v56 }
  0xac   : > { %v994_v45 = vpop.eup %742  ;;  %v433_v57 = vsub.f32 1.5, %v432_v52  ;;  %vm298_vm3 = vcmp.eq.f32.partialorder %v889_v23, 0.0  ;;  %vm436_vm4 = vcmp.eq.f32.partialorder %v909_v46, inf  ;;  %v1039_v2 = vmul.f32 %v473_v1, %v465_v35 }
  0xad   : > { %v442_v53 = vmul.f32 %v994_v45, %v940_v5  ;;  %v1014_v60 = vpop.eup %744  ;;  %v421_v15 = vsub.f32 1.5, %v420_v62  ;;  %v306_v47 = vmul.f32 %v944_v9, %v305_v7  ;;  %v295_v30 = vmul.f32 %v294_v63, %v889_v23 }
  0xae   : > { %v747_v12 = vpop.eup %746  ;;  %v326_v16 = vmul.f32 %v1014_v60, %v971_v26  ;;  %v434_v18 = vmul.f32 %v739_v27, %v433_v57  ;;  %vm310_vm5 = vcmp.eq.f32.partialorder %v897_v38, 0.0  ;;  %vm438_vm6 = vcmp.eq.f32.partialorder %v909_v46, 0.0 }
  0xaf   : > { %v992_v44 = vpop.xlane.xlu0 %367  ;;  %v443_v58 = vmul.f32 %v994_v45, %v442_v53  ;;  %v314_v19 = vmul.f32 %v747_v12, %v942_v8  ;;  %v422_v22 = vmul.f32 %v741_v34, %v421_v15  ;;  %v416_v32 = vsel %vm414_vm14, %v415_v28, %v413_v17 }
  0xb0   : > { %748 = vrsqrt.f32 %v992_v44  ;;  %v327_v25 = vmul.f32 %v1014_v60, %v326_v16  ;;  %v285_v11 = vsel %vm284_vm0, %v891_v24, %v283_v14  ;;  %v439_v1 = vand.u32 2147483648, %v909_v46 }
  0xb1   : > { %v444_v4 = vmul.f32 0.5, %v443_v58  ;;  %v315_v27 = vmul.f32 %v747_v12, %v314_v19  ;;  %750 = vrcp.f32 %v1039_v2  ;;  %v307_v34 = vmul.f32 %v306_v47, %v897_v38 }
  0xb2   : > { %v435_v35 = vmul.f32 %v434_v18, %v909_v46  ;;  %v423_v39 = vmul.f32 %v422_v22, %v901_v42  ;;  %vm424_vm7 = vcmp.eq.f32.partialorder %v901_v42, inf  ;;  %v328_v20 = vmul.f32 0.5, %v327_v25 }
  0xb3   : > { %v445_v9 = vsub.f32 1.5, %v444_v4  ;;  %v316_v36 = vmul.f32 0.5, %v315_v27  ;;  %v1060_v28 = vmul.f32 %v474_v61, %v466_v13  ;;  %v297_v40 = vsel %vm296_vm15, %v889_v23, %v295_v30 }
  0xb4   : > { %vm426_vm8 = vcmp.eq.f32.partialorder %v901_v42, 0.0  ;;  %v476_v48 = vmax.f32 %v416_v32, 1e-08  ;;  %v288_v50 = vsel %vm286_vm1, %v287_v10, %v285_v11  ;;  %v427_v33 = vand.u32 2147483648, %v901_v42 }
  0xb5   : > { %v446_v41 = vmul.f32 %v994_v45, %v445_v9  ;;  %v317_v43 = vsub.f32 1.5, %v316_v36  ;;  %v309_v53 = vsel %vm308_vm2, %v897_v38, %v307_v34  ;;  %v437_v6 = vsel %vm436_vm4, %v909_v46, %v435_v35 }
  0xb6   : > { %v1033_v21 = vpop.eup %748  ;;  %vm448_vm9 = vcmp.eq.f32.partialorder %v940_v5, inf  ;;  %v300_v24 = vsel %vm298_vm3, %v299_v49, %v297_v40  ;;  %v425_v55 = vsel %vm424_vm7, %v901_v42, %v423_v39  ;;  %v329_v56 = vsub.f32 1.5, %v328_v20 }
  0xb7   : > { %v454_v31 = vmul.f32 %v1033_v21, %v992_v44  ;;  %v318_v54 = vmul.f32 %v747_v12, %v317_v43  ;;  %v1077_v45 = vpop.eup %750  ;;  %752 = vrcp.f32 %v1060_v28  ;;  %v468_v7 = vmax.f32 %v288_v50, 1e-08 }
  0xb8   : > { %v447_v57 = vmul.f32 %v446_v41, %v940_v5  ;;  %vm450_vm10 = vcmp.eq.f32.partialorder %v940_v5, 0.0  ;;  %v451_v58 = vand.u32 2147483648, %v940_v5  ;;  %v312_v61 = vsel %vm310_vm5, %v311_v3, %v309_v53 }
  0xb9   : > { %v455_v37 = vmul.f32 %v1033_v21, %v454_v31  ;;  %v440_v23 = vsel %vm438_vm6, %v439_v1, %v437_v6  ;;  %v319_v49 = vmul.f32 %v318_v54, %v942_v8  ;;  %v469_v62 = vmax.f32 %v300_v24, 1e-08 }
  0xba   : > { %v428_v63 = vsel %vm426_vm8, %v427_v33, %v425_v55  ;;  %vm332_vm11 = vcmp.eq.f32.partialorder %v971_v26, inf  ;;  %v490_v4 = vmul.f32 %v1077_v45, %v1039_v2  ;;  %v330_v12 = vmul.f32 %v1014_v60, %v329_v56 }
  0xbb   : > { %v456_v52 = vmul.f32 0.5, %v455_v37  ;;  %v335_v38 = vand.u32 2147483648, %v971_v26  ;;  %vm320_vm12 = vcmp.eq.f32.partialorder %v942_v8, inf  ;;  %v1107_v46 = vmul.f32 %v475_v59, %v467_v29 }
  0xbc   : > { %v470_v3 = vmax.f32 %v312_v61, 1e-08  ;;  %v478_v42 = vmax.f32 %v440_v23, 1e-08  ;;  %v449_v13 = vsel %vm448_vm9, %v940_v5, %v447_v57  ;;  %v1112_v14 = vmul.f32 %v476_v48, %v468_v7 }
  0xbd   : > { %v457_v10 = vsub.f32 1.5, %v456_v52  ;;  %v1114_v15 = vpop.eup %752  ;;  %v477_v60 = vmax.f32 %v428_v63, 1e-08  ;;  %vm334_vm13 = vcmp.eq.f32.partialorder %v971_v26, 0.0  ;;  %v321_v16 = vsel %vm320_vm12, %v942_v8, %v319_v49 }
  0xbe   : > { %754 = vrcp.f32 %v1107_v46  ;;  %vm322_vm14 = vcmp.eq.f32.partialorder %v942_v8, 0.0  ;;  %v323_v29 = vand.u32 2147483648, %v942_v8  ;;  %v491_v51 = vsub.f32 1.0, %v490_v4 }
  0xbf   : > { %v458_v0 = vmul.f32 %v1033_v21, %v457_v10  ;;  %v505_v59 = vmul.f32 %v1114_v15, %v1060_v28  ;;  %v452_v17 = vsel %vm450_vm10, %v451_v58, %v449_v13  ;;  %v331_v47 = vmul.f32 %v330_v12, %v971_v26 }
  0xc0   : > { %vm460_vm15 = vcmp.eq.f32.partialorder %v992_v44, inf  ;;  %756 = vrcp.f32 %v1112_v14  ;;  %v324_v18 = vsel %vm322_vm14, %v323_v29, %v321_v16  ;;  %vm462_vm0 = vcmp.eq.f32.partialorder %v992_v44, 0.0 }
  0xc1   : > { %v498_v19 = vand.u32 2147483647, %v1039_v2  ;;  %v506_v21 = vsub.f32 1.0, %v505_v59  ;;  %v459_v8 = vmul.f32 %v458_v0, %v992_v44  ;;  %v463_v22 = vand.u32 2147483648, %v992_v44 }
  0xc2   : > { %v1133_v25 = vmul.f32 %v477_v60, %v469_v62  ;;  %v1135_v5 = vmul.f32 %v478_v42, %v470_v3  ;;  %v479_v30 = vmax.f32 %v452_v17, 1e-08  ;;  %v492_v9 = vmul.f32 %v1077_v45, %v491_v51  ;;  %v190_v42 = vpop.xlane.xlu2 %189 }
  0xc3   : > { %vm494_vm1 = vweird.f32 %v1039_v2  ;;  %v500_v27 = vand.u32 2147483648, %v1039_v2  ;;  %v333_v32 = vsel %vm332_vm11, %v971_v26, %v331_v47  ;;  %v471_v11 = vmax.f32 %v324_v18, 1e-08 }
  0xc4   : > { %v1140_v31 = vpop.eup %754  ;;  %v507_v1 = vmul.f32 %v1114_v15, %v506_v21  ;;  %758 = vrcp.f32 %v1133_v25  ;;  %vm1147_vm2 = vcmp.eq.f32.partialorder %v498_v19, 8.507059e+37  ;;  %v513_v35 = vand.u32 2147483647, %v1060_v28 }
  0xc5   : > { %v520_v36 = vmul.f32 %v1140_v31, %v1107_v46  ;;  %760 = vrcp.f32 %v1135_v5  ;;  %v461_v39 = vsel %vm460_vm15, %v992_v44, %v459_v8  ;;  %vm495_vm3 = vweird.f32 %v1077_v45 }
  0xc6   : > { %v1155_v37 = vpop.eup %756  ;;  %vm509_vm4 = vweird.f32 %v1060_v28  ;;  %v515_v20 = vand.u32 2147483648, %v1060_v28  ;;  %v336_v40 = vsel %vm334_vm13, %v335_v38, %v333_v32  ;;  %v493_v41 = vadd.f32 %v1077_v45, %v492_v9  ;;  %vm1185_vm7 = vmor %vm494_vm1, %vm495_vm3  ;;  %v187_v38 = vpop.xlane.xlu1 %186 }
  0xc7   : > { %v521_v43 = vsub.f32 1.0, %v520_v36  ;;  %v535_v48 = vmul.f32 %v1155_v37, %v1112_v14  ;;  %v501_v50 = vor.u32 1.1754944e-38, %v500_v27  ;;  %v508_v33 = vadd.f32 %v1114_v15, %v507_v1  ;;  %v193_v36 = vpop.xlane.xlu0 %192 }
  0xc8   : > { %vm510_vm5 = vweird.f32 %v1114_v15  ;;  %v1170_v52 = vmul.f32 %v479_v30, %v471_v11  ;;  %v464_v53 = vsel %vm462_vm0, %v463_v22, %v461_v39  ;;  %vm1174_vm6 = vcmp.eq.f32.partialorder %v513_v35, 8.507059e+37 }
  0xc9   : > { %v528_v26 = vand.u32 2147483647, %v1107_v46  ;;  %v536_v54 = vsub.f32 1.0, %v535_v48  ;;  %v472_v55 = vmax.f32 %v336_v40, 1e-08  ;;  %v516_v44 = vor.u32 1.1754944e-38, %v515_v20  ;;  %vm1198_vm8 = vmor %vm509_vm4, %vm510_vm5 }
  0xca   : > { %v1179_v24 = vpop.eup %758  ;;  %v522_v7 = vmul.f32 %v1140_v31, %v521_v43  ;;  %762 = vrcp.f32 %v1170_v52  ;;  %v497_v58 = vsel %vm1185_vm7, %v1077_v45, %v493_v41  ;;  %vm524_vm9 = vweird.f32 %v1107_v46 }
  0xcb   : > { %v1191_v57 = vpop.eup %760  ;;  %v537_v2 = vmul.f32 %v1155_v37, %v536_v54  ;;  %v550_v23 = vmul.f32 %v1179_v24, %v1133_v25  ;;  %v480_v49 = vmax.f32 %v464_v53, 1e-08  ;;  %v512_v10 = vsel %vm1198_vm8, %v1114_v15, %v508_v33  ;;  %v199_v33 = vpop.xlane.xlu2 %198 }
  0xcc   : > { %v530_v45 = vand.u32 2147483648, %v1107_v46  ;;  %v565_v28 = vmul.f32 %v1191_v57, %v1135_v5  ;;  %vm1212_vm10 = vcmp.eq.f32.partialorder %v528_v26, 8.507059e+37  ;;  %vm539_vm11 = vweird.f32 %v1112_v14 }
  0xcd   : > { %v543_v63 = vand.u32 2147483647, %v1112_v14  ;;  %v551_v4 = vsub.f32 1.0, %v550_v23  ;;  %v502_v12 = vsel %vm1147_vm2, %v501_v50, %v497_v58  ;;  %v523_v3 = vadd.f32 %v1140_v31, %v522_v7 }
  0xce   : > { %vm525_vm12 = vweird.f32 %v1140_v31  ;;  %vm540_vm13 = vweird.f32 %v1155_v37  ;;  %v517_v13 = vsel %vm1174_vm6, %v516_v44, %v512_v10  ;;  %v538_v15 = vadd.f32 %v1155_v37, %v537_v2  ;;  %v196_v40 = vpop.xlane.xlu1 %195 }
  0xcf   : > { %v552_v60 = vmul.f32 %v1179_v24, %v551_v4  ;;  %v566_v16 = vsub.f32 1.0, %v565_v28  ;;  %v531_v29 = vor.u32 1.1754944e-38, %v530_v45  ;;  %v545_v51 = vand.u32 2147483648, %v1112_v14  ;;  %vm1234_vm14 = vmor %vm524_vm9, %vm525_vm12  ;;  %v202_v28 = vpop.xlane.xlu0 %201 }
  0xd0   : > { %v1227_v0 = vpop.eup %762  ;;  %v558_v59 = vand.u32 2147483647, %v1133_v25  ;;  %v560_v17 = vand.u32 2147483648, %v1133_v25  ;;  %v503_v47 = vmul.f32 %v502_v12, %v187_v38  ;;  %vm555_vm15 = vweird.f32 %v1179_v24  ;;  %vm1249_vm0 = vmor %vm539_vm11, %vm540_vm13 }
  0xd1   : > { %v553_v19 = vadd.f32 %v1179_v24, %v552_v60  ;;  %v580_v21 = vmul.f32 %v1227_v0, %v1170_v52  ;;  %v518_v8 = vmul.f32 %v517_v13, %v190_v42  ;;  %v527_v22 = vsel %vm1234_vm14, %v1140_v31, %v523_v3 }
  0xd2   : > { %vm1253_vm1 = vcmp.eq.f32.partialorder %v543_v63, 8.507059e+37  ;;  %v1257_v9 = vmul.f32 %v480_v49, %v472_v55  ;;  %v542_v27 = vsel %vm1249_vm0, %v1155_v37, %v538_v15  ;;  %vm554_vm2 = vweird.f32 %v1133_v25 }
  0xd3   : > { %v567_v31 = vmul.f32 %v1191_v57, %v566_v16  ;;  %v581_v32 = vsub.f32 1.0, %v580_v21  ;;  %v546_v14 = vor.u32 1.1754944e-38, %v545_v51  ;;  %vm1264_vm3 = vmor %vm554_vm2, %vm555_vm15  ;;  %vm1268_vm4 = vcmp.eq.f32.partialorder %v558_v59, 8.507059e+37  ;;  %v208_v16 = vpop.xlane.xlu2 %207 }
  0xd4   : > { %v561_v34 = vor.u32 1.1754944e-38, %v560_v17  ;;  %764 = vrcp.f32 %v1257_v9  ;;  %v532_v35 = vsel %vm1212_vm10, %v531_v29, %v527_v22  ;;  %v557_v25 = vsel %vm1264_vm3, %v1179_v24, %v553_v19 }
  0xd5   : > { %vm569_vm5 = vweird.f32 %v1135_v5  ;;  %v582_v37 = vmul.f32 %v1227_v0, %v581_v32  ;;  %v609_v39 = vadd.f32 %v518_v8, %v503_v47  ;;  %v547_v20 = vsel %vm1253_vm1, %v546_v14, %v542_v27 }
  0xd6   : > { %vm570_vm6 = vweird.f32 %v1191_v57  ;;  %v568_v41 = vadd.f32 %v1191_v57, %v567_v31  ;;  %v573_v43 = vand.u32 2147483647, %v1135_v5  ;;  %vm585_vm7 = vweird.f32 %v1227_v0  ;;  %v205_v63 = vpop.xlane.xlu1 %204 }
  0xd7   : > { %v583_v48 = vadd.f32 %v1227_v0, %v582_v37  ;;  %v533_v50 = vmul.f32 %v532_v35, %v193_v36  ;;  %v562_v53 = vsel %vm1268_vm4, %v561_v34, %v557_v25  ;;  %v575_v6 = vand.u32 2147483648, %v1135_v5  ;;  %vm1293_vm8 = vmor %vm569_vm5, %vm570_vm6 }
  0xd8   : > { %v590_v26 = vand.u32 2147483648, %v1170_v52  ;;  %v548_v54 = vmul.f32 %v547_v20, %v196_v40  ;;  %vm584_vm9 = vweird.f32 %v1170_v52  ;;  %v588_v55 = vand.u32 2147483647, %v1170_v52 }
  0xd9   : > { %v776_v56 = vmov 64.0   ;;  %v610_v7 = vadd.f32 %v609_v39, %v533_v50  ;;  %vm586_vm10 = vmor %vm584_vm9, %vm585_vm7  ;;  %v563_v58 = vmul.f32 %v562_v53, %v199_v33  ;;  %v572_v61 = vsel %vm1293_vm8, %v1191_v57, %v568_v41 }
  0xda   : > { %766 = vrcp.f32 %v776_v56  ;;  %v765_v44 = vpop.eup %764  ;;  %v587_v5 = vsel %vm586_vm10, %v1227_v0, %v583_v48  ;;  %v576_v23 = vor.u32 1.1754944e-38, %v575_v6  ;;  %v591_v49 = vor.u32 1.1754944e-38, %v590_v26 }
  0xdb   : > { %v595_v2 = vmul.f32 %v765_v44, %v1257_v9  ;;  %v611_v10 = vadd.f32 %v610_v7, %v548_v54  ;;  %vm574_vm11 = vcmp.eq.f32.partialorder %v573_v43, 8.507059e+37  ;;  %vm589_vm12 = vcmp.eq.f32.partialorder %v588_v55, 8.507059e+37 }
  0xdc   : > { %v577_v45 = vsel %vm574_vm11, %v576_v23, %v572_v61  ;;  %v592_v62 = vsel %vm589_vm12, %v591_v49, %v587_v5  ;;  %v605_v4 = vand.u32 2147483648, %v1257_v9  ;;  %vm600_vm13 = vweird.f32 %v765_v44 }
  0xdd   : > { %v596_v52 = vsub.f32 1.0, %v595_v2  ;;  %v612_v38 = vadd.f32 %v611_v10, %v563_v58  ;;  %v603_v57 = vand.u32 2147483647, %v1257_v9  ;;  %v578_v42 = vmul.f32 %v577_v45, %v202_v28 }
  0xde   : > { %v593_v13 = vmul.f32 %v592_v62, %v205_v63  ;;  %vm599_vm14 = vweird.f32 %v1257_v9  ;;  %v606_v0 = vor.u32 1.1754944e-38, %v605_v4  ;;  %v630_v46 = vlaneseq }
  0xdf   : > { %v597_v3 = vmul.f32 %v765_v44, %v596_v52  ;;  %vm601_vm15 = vmor %vm599_vm14, %vm600_vm13  ;;  %v613_v29 = vadd.f32 %v612_v38, %v578_v42  ;;  %vm604_vm0 = vcmp.eq.f32.partialorder %v603_v57, 8.507059e+37  ;;  %vm635_vm3 = vcmask 0  }
  0xe0   : > { %v767_v12 = vpop.eup %766  ;;  %v631_v31 = vand.u32 127, %v630_v46 }
  0xe1   : > { %v598_v15 = vadd.f32 %v765_v44, %v597_v3  ;;  %v623_v60 = vmul.f32 64.0, %v767_v12  ;;  %v614_v17 = vadd.f32 %v613_v29, %v593_v13  ;;  %vm627_vm1 = vweird.f32 %v767_v12 }
  0xe2   : > { %vm632_vm2 = vcmp.eq.s32.totalorder %v631_v31, 0 }
  0xe3   : > { %v602_v51 = vsel %vm601_vm15, %v765_v44, %v598_v15  ;;  %v624_v18 = vsub.f32 1.0, %v623_v60 }
  0xe4   : > { %v607_v59 = vsel %vm604_vm0, %v606_v0, %v602_v51 }
  0xe5   : > { %v608_v47 = vmul.f32 %v607_v59, %v208_v16  ;;  %v625_v8 = vmul.f32 %v767_v12, %v624_v18 }
  0xe7   : > { %v615_v19 = vadd.f32 %v614_v17, %v608_v47  ;;  %v626_v27 = vadd.f32 %v767_v12, %v625_v8 }
  0xe9   : > { %v616_v21 = vrot.slane %v615_v19, 4  ;;  %v628_v14 = vsel %vm627_vm1, %v767_v12, %v626_v27 }
  0xeb   : > { %v617_v22 = vadd.f32 %v616_v21, %v615_v19 }
  0xed   : > { %v618_v30 = vrot.slane %v617_v22, 2 }
  0xef   : > { %v619_v9 = vadd.f32 %v618_v30, %v617_v22 }
  0xf1   : > { %v620_v32 = vrot.slane %v619_v9, 1 }
  0xf3   : > { %v621_v11 = vadd.f32 %v620_v32, %v619_v9 }
  0xf5   : > { %v629_v1 = vmul.f32 %v628_v14, %v621_v11 }
  0xf7   : > { %v633_v34 = vsel %vm632_vm2, %v629_v1, 0.0 }
  0xf8   : > { %636 = vst.msk [vmem:[%s159_s20] sm:$0x1] %vm635_vm3, %v633_v34 }
  0xf9 PF: > { %s12_s9 = sadd.s32 1, %s774_s9  }
  0xfa   : > { %p9_p4 = scmp.ge.s32.totalorder %s12_s9, 4  }
  0xfc   :  { %11 = sbr.rel (!%p9_p4) target bundleno = 1 (0x1), region = 61 }

</bundles_post_ra>
